<compile_context>
chip_gen: v6e
topology: v6e:2x2x1
jax: 0.10.0
libtpu: 0.0.40
codegen_flags: <defaults>
</compile_context>

<pallas_src>
import functools
import math

import jax
import jax.numpy as jnp
from jax import lax
from jax.experimental import pallas as pl
from jax.experimental.pallas import tpu as pltpu


def _mha_kernel(x_ref, w_qkv_ref, w_out_ref, b_ref, o_ref, *, num_heads, batch):
    # x_ref:     (L*N + 2*S*N, E)  rows = [q-rows ; k-rows ; v-rows], each (token, batch)
    # w_qkv_ref: (E, 3E) = [Wq^T | Wk^T | Wv^T]
    # w_out_ref: (E, E)  = Wo^T
    # b_ref:     (4, E)  = [bq; bk; bv; bo]
    # o_ref:     (L*N, E)
    LN, E = o_ref.shape
    SN = (x_ref.shape[0] - LN) // 2
    Dh = E // num_heads
    scale = 1.0 / math.sqrt(Dh)

    x = x_ref[...].astype(jnp.float32)
    w_qkv = w_qkv_ref[...].astype(jnp.float32)
    w_out = w_out_ref[...].astype(jnp.float32)
    b = b_ref[...].astype(jnp.float32)

    # ---- fused QKV projection: ONE MXU pass over [q; k; v] @ [Wq^T | Wk^T | Wv^T]
    y = jnp.dot(x, w_qkv, preferred_element_type=jnp.float32)         # (LN+2SN, 3E)

    qp = (y[0:LN, 0:E] + b[0:1, :]) * scale                           # (LN, E)
    kp = y[LN:LN + SN, E:2 * E] + b[1:2, :]                           # (SN, E)
    vp = y[LN + SN:LN + 2 * SN, 2 * E:3 * E] + b[2:3, :]              # (SN, E)

    # ---- batch-block mask generated in-kernel (no DMA, no HBM/VMEM mask buffer)
    row_b = lax.broadcasted_iota(jnp.int32, (LN, SN), 0) % batch
    col_b = lax.broadcasted_iota(jnp.int32, (LN, SN), 1) % batch
    mask_bias = jnp.where(row_b == col_b, 0.0, -1e30).astype(jnp.float32)

    # ---- per-head attention over ALL batches at once via the block-diagonal mask.
    #      Statically unrolled (H is small); 2-D matmuls only (guaranteed lowering).
    ctx_heads = []
    for h in range(num_heads):
        lo = h * Dh
        qh = qp[:, lo:lo + Dh]                       # (LN, Dh)
        kh = kp[:, lo:lo + Dh]                       # (SN, Dh)
        vh = vp[:, lo:lo + Dh]                       # (SN, Dh)

        # NT contraction — no explicit kh.T / XLU transpose
        s = lax.dot_general(qh, kh,
                            dimension_numbers=(((1,), (1,)), ((), ())),
                            preferred_element_type=jnp.float32)       # (LN, SN)
        s = s + mask_bias                             # keep only same-batch columns

        m = jnp.max(s, axis=-1, keepdims=True)
        e = jnp.exp(s - m)
        denom = jnp.sum(e, axis=-1, keepdims=True)
        # approx=True would move this to the EUP for free, but ~12-bit accuracy risks
        # the 1e-4 tolerance (review correctness note) — kept exact.
        p = e * pl.reciprocal(denom, approx=False)

        ctx_heads.append(jnp.dot(p, vh, preferred_element_type=jnp.float32))  # (LN, Dh)

    # ---- single fused output projection: one lane-concat, one (LN,E)@(E,E) matmul
    ctx = jnp.concatenate(ctx_heads, axis=1)                           # (LN, E)
    out = jnp.dot(ctx, w_out, preferred_element_type=jnp.float32) + b[3:4, :]
    o_ref[...] = out.astype(o_ref.dtype)


def multihead_attention_pallas(q, k, v, params, num_heads):
    """q: (L, N, E); k, v: (S, N, E). Returns (L, N, E)."""
    L, N, E = q.shape
    S = k.shape[0]
    LN, SN = L * N, S * N

    # Free row-major reshapes (NOT transposes): row index = token * N + batch.
    # Pre-stack [q; k; v] so the kernel receives ONE activation operand (one DMA).
    x_all = jnp.concatenate(
        [q.reshape(LN, E), k.reshape(SN, E), v.reshape(SN, E)], axis=0)  # (LN+2SN, E)

    # Pre-transpose / fuse weights so the kernel computes x @ W in one pass.
    w_qkv = jnp.concatenate(
        [params["wq"].T, params["wk"].T, params["wv"].T], axis=1)        # (E, 3E)
    w_out = params["wo"].T                                               # (E, E)
    b_all = jnp.stack(
        [params["bq"], params["bk"], params["bv"], params["bo"]], axis=0)  # (4, E)

    kernel = functools.partial(_mha_kernel, num_heads=num_heads, batch=N)

    vmem = pl.BlockSpec(memory_space=pltpu.MemorySpace.VMEM)
    out2 = pl.pallas_call(
        kernel,
        out_shape=jax.ShapeDtypeStruct((LN, E), q.dtype),
        in_specs=[vmem, vmem, vmem, vmem],
        out_specs=vmem,
    )(x_all, w_qkv, w_out, b_all)

    return out2.reshape(L, N, E)


def _reference_mha(q, k, v, params, num_heads):
    """Pure-JAX reference (eval-mode nn.MultiheadAttention)."""
    L, N, E = q.shape
    S = k.shape[0]
    Dh = E // num_heads
    scale = 1.0 / math.sqrt(Dh)

    def proj(x, w, b):
        return jnp.einsum("lne,fe->lnf", x, w) + b

    qp = proj(q, params["wq"], params["bq"])
    kp = proj(k, params["wk"], params["bk"])
    vp = proj(v, params["wv"], params["bv"])

    qh = qp.reshape(L, N, num_heads, Dh).transpose(1, 2, 0, 3) * scale  # (N,H,L,Dh)
    kh = kp.reshape(S, N, num_heads, Dh).transpose(1, 2, 0, 3)          # (N,H,S,Dh)
    vh = vp.reshape(S, N, num_heads, Dh).transpose(1, 2, 0, 3)          # (N,H,S,Dh)

    s = jnp.einsum("nhld,nhsd->nhls", qh, kh)
    p = jax.nn.softmax(s, axis=-1)
    ctx = jnp.einsum("nhls,nhsd->nhld", p, vh)                          # (N,H,L,Dh)
    ctx = ctx.transpose(2, 0, 1, 3).reshape(L, N, E)
    return jnp.einsum("lne,fe->lnf", ctx, params["wo"]) + params["bo"]


def init_params(key, hidden_dim):
    """Deterministic synthetic weights matching nn.MultiheadAttention shapes."""
    E = hidden_dim
    ks = jax.random.split(key, 8)
    bound = 1.0 / math.sqrt(E)
    u = lambda k, shape: jax.random.uniform(k, shape, jnp.float32, -bound, bound)
    # in_proj_weight is (3E, E) split into Wq, Wk, Wv; out_proj.weight is (E, E)
    return {
        "wq": u(ks[0], (E, E)), "wk": u(ks[1], (E, E)), "wv": u(ks[2], (E, E)),
        "bq": u(ks[3], (E,)),   "bk": u(ks[4], (E,)),   "bv": u(ks[5], (E,)),
        "wo": u(ks[6], (E, E)), "bo": u(ks[7], (E,)),
    }


if __name__ == "__main__":
    nb_head = 4
    hidden_dim = 32
    L = 8   # target (query) sequence length
    S = 8   # source (key/value) sequence length
    N = 2   # batch

    key = jax.random.PRNGKey(0)
    kq, kk, kv, kp = jax.random.split(key, 4)
    q = jax.random.normal(kq, (L, N, hidden_dim), jnp.float32)
    k = jax.random.normal(kk, (S, N, hidden_dim), jnp.float32)
    v = jax.random.normal(kv, (S, N, hidden_dim), jnp.float32)
    params = init_params(kp, hidden_dim)

    out = multihead_attention_pallas(q, k, v, params, nb_head)
    out = jax.block_until_ready(out)

    ref = _reference_mha(q, k, v, params, nb_head)
    assert out.shape == (L, N, hidden_dim)
    assert jnp.allclose(out, ref, atol=1e-4, rtol=1e-4), "mismatch vs reference"

    print("KERNEL_OK")
</pallas_src>

<mosaic_0001>
module attributes {stable_mosaic.version = 11 : i64} {
  func.func @_mha_kernel(%arg0: memref<48x32xf32, #tpu.memory_space<vmem>>, %arg1: memref<32x96xf32, #tpu.memory_space<vmem>>, %arg2: memref<32x32xf32, #tpu.memory_space<vmem>>, %arg3: memref<4x32xf32, #tpu.memory_space<vmem>>, %arg4: memref<16x32xf32, #tpu.memory_space<vmem>>) attributes {dimension_semantics = [], scalar_prefetch = 0 : i64, scratch_operands = 0 : i64, tpu.core_type = #tpu.core_type<tc>} {
    %c0 = arith.constant 0 : index
    %c0_0 = arith.constant 0 : index
    %0 = vector.load %arg0[%c0, %c0_0] : memref<48x32xf32, #tpu.memory_space<vmem>>, vector<48x32xf32>
    %c0_1 = arith.constant 0 : index
    %c0_2 = arith.constant 0 : index
    %1 = vector.load %arg1[%c0_1, %c0_2] : memref<32x96xf32, #tpu.memory_space<vmem>>, vector<32x96xf32>
    %c0_3 = arith.constant 0 : index
    %c0_4 = arith.constant 0 : index
    %2 = vector.load %arg2[%c0_3, %c0_4] : memref<32x32xf32, #tpu.memory_space<vmem>>, vector<32x32xf32>
    %c0_5 = arith.constant 0 : index
    %c0_6 = arith.constant 0 : index
    %3 = vector.load %arg3[%c0_5, %c0_6] : memref<4x32xf32, #tpu.memory_space<vmem>>, vector<4x32xf32>
    %cst = arith.constant dense<0.000000e+00> : vector<48x96xf32>
    %4 = tpu.matmul %0, %1, %cst {dimension_numbers = #tpu.dot_dimension_numbers<[1], [0], [0], [1], [0, 0, 1, 1], [], []>} : vector<48x32xf32>, vector<32x96xf32>, vector<48x96xf32> -> vector<48x96xf32>
    %5 = vector.extract_strided_slice %4 {offsets = [0, 0], sizes = [16, 32], strides = [1, 1]} : vector<48x96xf32> to vector<16x32xf32>
    %6 = vector.extract_strided_slice %3 {offsets = [0, 0], sizes = [1, 32], strides = [1, 1]} : vector<4x32xf32> to vector<1x32xf32>
    %7 = vector.broadcast %6 : vector<1x32xf32> to vector<16x32xf32>
    %8 = arith.addf %5, %7 : vector<16x32xf32>
    %cst_7 = arith.constant 0.353553385 : f32
    %9 = vector.broadcast %cst_7 : f32 to vector<16x32xf32>
    %10 = arith.mulf %8, %9 : vector<16x32xf32>
    %11 = vector.extract_strided_slice %4 {offsets = [16, 32], sizes = [16, 32], strides = [1, 1]} : vector<48x96xf32> to vector<16x32xf32>
    %12 = vector.extract_strided_slice %3 {offsets = [1, 0], sizes = [1, 32], strides = [1, 1]} : vector<4x32xf32> to vector<1x32xf32>
    %13 = vector.broadcast %12 : vector<1x32xf32> to vector<16x32xf32>
    %14 = arith.addf %11, %13 : vector<16x32xf32>
    %15 = vector.extract_strided_slice %4 {offsets = [32, 64], sizes = [16, 32], strides = [1, 1]} : vector<48x96xf32> to vector<16x32xf32>
    %16 = vector.extract_strided_slice %3 {offsets = [2, 0], sizes = [1, 32], strides = [1, 1]} : vector<4x32xf32> to vector<1x32xf32>
    %17 = vector.broadcast %16 : vector<1x32xf32> to vector<16x32xf32>
    %18 = arith.addf %15, %17 : vector<16x32xf32>
    %19 = tpu.iota {dimensions = array<i32: 0>} : vector<16x16xi32>
    %c2_i32 = arith.constant 2 : i32
    %c0_i32 = arith.constant 0 : i32
    %20 = arith.cmpi eq, %c2_i32, %c0_i32 : i32
    %c1_i32 = arith.constant 1 : i32
    %21 = arith.select %20, %c1_i32, %c2_i32 : i32
    %22 = vector.broadcast %21 : i32 to vector<16x16xi32>
    %23 = arith.remsi %19, %22 : vector<16x16xi32>
    %c0_i32_8 = arith.constant 0 : i32
    %24 = vector.broadcast %c0_i32_8 : i32 to vector<16x16xi32>
    %25 = arith.cmpi ne, %23, %24 : vector<16x16xi32>
    %c0_i32_9 = arith.constant 0 : i32
    %26 = vector.broadcast %c0_i32_9 : i32 to vector<16x16xi32>
    %27 = arith.cmpi slt, %23, %26 : vector<16x16xi32>
    %c0_i32_10 = arith.constant 0 : i32
    %28 = arith.cmpi slt, %21, %c0_i32_10 : i32
    %29 = vector.broadcast %28 : i1 to vector<16x16xi1>
    %30 = vector.broadcast %29 : vector<16x16xi1> to vector<16x16xi1>
    %31 = arith.xori %27, %30 : vector<16x16xi1>
    %32 = arith.andi %31, %25 : vector<16x16xi1>
    %33 = vector.broadcast %21 : i32 to vector<16x16xi32>
    %34 = arith.addi %23, %33 : vector<16x16xi32>
    %35 = arith.select %32, %34, %23 : vector<16x16xi1>, vector<16x16xi32>
    %36 = tpu.iota {dimensions = array<i32: 1>} : vector<16x16xi32>
    %c2_i32_11 = arith.constant 2 : i32
    %c0_i32_12 = arith.constant 0 : i32
    %37 = arith.cmpi eq, %c2_i32_11, %c0_i32_12 : i32
    %c1_i32_13 = arith.constant 1 : i32
    %38 = arith.select %37, %c1_i32_13, %c2_i32_11 : i32
    %39 = vector.broadcast %38 : i32 to vector<16x16xi32>
    %40 = arith.remsi %36, %39 : vector<16x16xi32>
    %c0_i32_14 = arith.constant 0 : i32
    %41 = vector.broadcast %c0_i32_14 : i32 to vector<16x16xi32>
    %42 = arith.cmpi ne, %40, %41 : vector<16x16xi32>
    %c0_i32_15 = arith.constant 0 : i32
    %43 = vector.broadcast %c0_i32_15 : i32 to vector<16x16xi32>
    %44 = arith.cmpi slt, %40, %43 : vector<16x16xi32>
    %c0_i32_16 = arith.constant 0 : i32
    %45 = arith.cmpi slt, %38, %c0_i32_16 : i32
    %46 = vector.broadcast %45 : i1 to vector<16x16xi1>
    %47 = vector.broadcast %46 : vector<16x16xi1> to vector<16x16xi1>
    %48 = arith.xori %44, %47 : vector<16x16xi1>
    %49 = arith.andi %48, %42 : vector<16x16xi1>
    %50 = vector.broadcast %38 : i32 to vector<16x16xi32>
    %51 = arith.addi %40, %50 : vector<16x16xi32>
    %52 = arith.select %49, %51, %40 : vector<16x16xi1>, vector<16x16xi32>
    %53 = arith.cmpi eq, %35, %52 : vector<16x16xi32>
    %cst_17 = arith.constant 0.000000e+00 : f32
    %cst_18 = arith.constant -1.000000e+30 : f32
    %54 = vector.broadcast %cst_17 : f32 to vector<16x16xf32>
    %55 = vector.broadcast %cst_18 : f32 to vector<16x16xf32>
    %56 = arith.select %53, %54, %55 : vector<16x16xi1>, vector<16x16xf32>
    %57 = vector.extract_strided_slice %10 {offsets = [0, 0], sizes = [16, 8], strides = [1, 1]} : vector<16x32xf32> to vector<16x8xf32>
    %58 = vector.extract_strided_slice %14 {offsets = [0, 0], sizes = [16, 8], strides = [1, 1]} : vector<16x32xf32> to vector<16x8xf32>
    %59 = vector.extract_strided_slice %18 {offsets = [0, 0], sizes = [16, 8], strides = [1, 1]} : vector<16x32xf32> to vector<16x8xf32>
    %cst_19 = arith.constant dense<0.000000e+00> : vector<16x16xf32>
    %60 = tpu.matmul %57, %58, %cst_19 {dimension_numbers = #tpu.dot_dimension_numbers<[1], [1], [0], [0], [0, 0, 1, 0], [], []>} : vector<16x8xf32>, vector<16x8xf32>, vector<16x16xf32> -> vector<16x16xf32>
    %61 = arith.addf %60, %56 : vector<16x16xf32>
    %cst_20 = arith.constant dense<0xFF800000> : vector<16xf32>
    %62 = vector.multi_reduction <maximumf>, %61, %cst_20 [1] : vector<16x16xf32> to vector<16xf32>
    %63 = vector.shape_cast %62 : vector<16xf32> to vector<16x1xf32>
    %64 = vector.broadcast %63 : vector<16x1xf32> to vector<16x16xf32>
    %65 = arith.subf %61, %64 : vector<16x16xf32>
    %66 = math.exp %65 : vector<16x16xf32>
    %cst_21 = arith.constant dense<0.000000e+00> : vector<16xf32>
    %67 = vector.multi_reduction <add>, %66, %cst_21 [1] : vector<16x16xf32> to vector<16xf32>
    %68 = vector.shape_cast %67 : vector<16xf32> to vector<16x1xf32>
    %69 = tpu.reciprocal %68 : vector<16x1xf32> -> vector<16x1xf32>
    %70 = vector.broadcast %69 : vector<16x1xf32> to vector<16x16xf32>
    %71 = arith.mulf %66, %70 : vector<16x16xf32>
    %cst_22 = arith.constant dense<0.000000e+00> : vector<16x8xf32>
    %72 = tpu.matmul %71, %59, %cst_22 {dimension_numbers = #tpu.dot_dimension_numbers<[1], [0], [0], [1], [0, 0, 1, 1], [], []>} : vector<16x16xf32>, vector<16x8xf32>, vector<16x8xf32> -> vector<16x8xf32>
    %73 = vector.extract_strided_slice %10 {offsets = [0, 8], sizes = [16, 8], strides = [1, 1]} : vector<16x32xf32> to vector<16x8xf32>
    %74 = vector.extract_strided_slice %14 {offsets = [0, 8], sizes = [16, 8], strides = [1, 1]} : vector<16x32xf32> to vector<16x8xf32>
    %75 = vector.extract_strided_slice %18 {offsets = [0, 8], sizes = [16, 8], strides = [1, 1]} : vector<16x32xf32> to vector<16x8xf32>
    %cst_23 = arith.constant dense<0.000000e+00> : vector<16x16xf32>
    %76 = tpu.matmul %73, %74, %cst_23 {dimension_numbers = #tpu.dot_dimension_numbers<[1], [1], [0], [0], [0, 0, 1, 0], [], []>} : vector<16x8xf32>, vector<16x8xf32>, vector<16x16xf32> -> vector<16x16xf32>
    %77 = arith.addf %76, %56 : vector<16x16xf32>
    %cst_24 = arith.constant dense<0xFF800000> : vector<16xf32>
    %78 = vector.multi_reduction <maximumf>, %77, %cst_24 [1] : vector<16x16xf32> to vector<16xf32>
    %79 = vector.shape_cast %78 : vector<16xf32> to vector<16x1xf32>
    %80 = vector.broadcast %79 : vector<16x1xf32> to vector<16x16xf32>
    %81 = arith.subf %77, %80 : vector<16x16xf32>
    %82 = math.exp %81 : vector<16x16xf32>
    %cst_25 = arith.constant dense<0.000000e+00> : vector<16xf32>
    %83 = vector.multi_reduction <add>, %82, %cst_25 [1] : vector<16x16xf32> to vector<16xf32>
    %84 = vector.shape_cast %83 : vector<16xf32> to vector<16x1xf32>
    %85 = tpu.reciprocal %84 : vector<16x1xf32> -> vector<16x1xf32>
    %86 = vector.broadcast %85 : vector<16x1xf32> to vector<16x16xf32>
    %87 = arith.mulf %82, %86 : vector<16x16xf32>
    %cst_26 = arith.constant dense<0.000000e+00> : vector<16x8xf32>
    %88 = tpu.matmul %87, %75, %cst_26 {dimension_numbers = #tpu.dot_dimension_numbers<[1], [0], [0], [1], [0, 0, 1, 1], [], []>} : vector<16x16xf32>, vector<16x8xf32>, vector<16x8xf32> -> vector<16x8xf32>
    %89 = vector.extract_strided_slice %10 {offsets = [0, 16], sizes = [16, 8], strides = [1, 1]} : vector<16x32xf32> to vector<16x8xf32>
    %90 = vector.extract_strided_slice %14 {offsets = [0, 16], sizes = [16, 8], strides = [1, 1]} : vector<16x32xf32> to vector<16x8xf32>
    %91 = vector.extract_strided_slice %18 {offsets = [0, 16], sizes = [16, 8], strides = [1, 1]} : vector<16x32xf32> to vector<16x8xf32>
    %cst_27 = arith.constant dense<0.000000e+00> : vector<16x16xf32>
    %92 = tpu.matmul %89, %90, %cst_27 {dimension_numbers = #tpu.dot_dimension_numbers<[1], [1], [0], [0], [0, 0, 1, 0], [], []>} : vector<16x8xf32>, vector<16x8xf32>, vector<16x16xf32> -> vector<16x16xf32>
    %93 = arith.addf %92, %56 : vector<16x16xf32>
    %cst_28 = arith.constant dense<0xFF800000> : vector<16xf32>
    %94 = vector.multi_reduction <maximumf>, %93, %cst_28 [1] : vector<16x16xf32> to vector<16xf32>
    %95 = vector.shape_cast %94 : vector<16xf32> to vector<16x1xf32>
    %96 = vector.broadcast %95 : vector<16x1xf32> to vector<16x16xf32>
    %97 = arith.subf %93, %96 : vector<16x16xf32>
    %98 = math.exp %97 : vector<16x16xf32>
    %cst_29 = arith.constant dense<0.000000e+00> : vector<16xf32>
    %99 = vector.multi_reduction <add>, %98, %cst_29 [1] : vector<16x16xf32> to vector<16xf32>
    %100 = vector.shape_cast %99 : vector<16xf32> to vector<16x1xf32>
    %101 = tpu.reciprocal %100 : vector<16x1xf32> -> vector<16x1xf32>
    %102 = vector.broadcast %101 : vector<16x1xf32> to vector<16x16xf32>
    %103 = arith.mulf %98, %102 : vector<16x16xf32>
    %cst_30 = arith.constant dense<0.000000e+00> : vector<16x8xf32>
    %104 = tpu.matmul %103, %91, %cst_30 {dimension_numbers = #tpu.dot_dimension_numbers<[1], [0], [0], [1], [0, 0, 1, 1], [], []>} : vector<16x16xf32>, vector<16x8xf32>, vector<16x8xf32> -> vector<16x8xf32>
    %105 = vector.extract_strided_slice %10 {offsets = [0, 24], sizes = [16, 8], strides = [1, 1]} : vector<16x32xf32> to vector<16x8xf32>
    %106 = vector.extract_strided_slice %14 {offsets = [0, 24], sizes = [16, 8], strides = [1, 1]} : vector<16x32xf32> to vector<16x8xf32>
    %107 = vector.extract_strided_slice %18 {offsets = [0, 24], sizes = [16, 8], strides = [1, 1]} : vector<16x32xf32> to vector<16x8xf32>
    %cst_31 = arith.constant dense<0.000000e+00> : vector<16x16xf32>
    %108 = tpu.matmul %105, %106, %cst_31 {dimension_numbers = #tpu.dot_dimension_numbers<[1], [1], [0], [0], [0, 0, 1, 0], [], []>} : vector<16x8xf32>, vector<16x8xf32>, vector<16x16xf32> -> vector<16x16xf32>
    %109 = arith.addf %108, %56 : vector<16x16xf32>
    %cst_32 = arith.constant dense<0xFF800000> : vector<16xf32>
    %110 = vector.multi_reduction <maximumf>, %109, %cst_32 [1] : vector<16x16xf32> to vector<16xf32>
    %111 = vector.shape_cast %110 : vector<16xf32> to vector<16x1xf32>
    %112 = vector.broadcast %111 : vector<16x1xf32> to vector<16x16xf32>
    %113 = arith.subf %109, %112 : vector<16x16xf32>
    %114 = math.exp %113 : vector<16x16xf32>
    %cst_33 = arith.constant dense<0.000000e+00> : vector<16xf32>
    %115 = vector.multi_reduction <add>, %114, %cst_33 [1] : vector<16x16xf32> to vector<16xf32>
    %116 = vector.shape_cast %115 : vector<16xf32> to vector<16x1xf32>
    %117 = tpu.reciprocal %116 : vector<16x1xf32> -> vector<16x1xf32>
    %118 = vector.broadcast %117 : vector<16x1xf32> to vector<16x16xf32>
    %119 = arith.mulf %114, %118 : vector<16x16xf32>
    %cst_34 = arith.constant dense<0.000000e+00> : vector<16x8xf32>
    %120 = tpu.matmul %119, %107, %cst_34 {dimension_numbers = #tpu.dot_dimension_numbers<[1], [0], [0], [1], [0, 0, 1, 1], [], []>} : vector<16x16xf32>, vector<16x8xf32>, vector<16x8xf32> -> vector<16x8xf32>
    %121 = tpu.concatenate %72, %88, %104, %120 in 1 : vector<16x8xf32>, vector<16x8xf32>, vector<16x8xf32>, vector<16x8xf32> -> vector<16x32xf32>
    %cst_35 = arith.constant dense<0.000000e+00> : vector<16x32xf32>
    %122 = tpu.matmul %121, %2, %cst_35 {dimension_numbers = #tpu.dot_dimension_numbers<[1], [0], [0], [1], [0, 0, 1, 1], [], []>} : vector<16x32xf32>, vector<32x32xf32>, vector<16x32xf32> -> vector<16x32xf32>
    %123 = vector.extract_strided_slice %3 {offsets = [3, 0], sizes = [1, 32], strides = [1, 1]} : vector<4x32xf32> to vector<1x32xf32>
    %124 = vector.broadcast %123 : vector<1x32xf32> to vector<16x32xf32>
    %125 = arith.addf %122, %124 : vector<16x32xf32>
    %c0_36 = arith.constant 0 : index
    %c0_37 = arith.constant 0 : index
    %126 = vector.load %arg4[%c0_36, %c0_37] : memref<16x32xf32, #tpu.memory_space<vmem>>, vector<16x32xf32>
    tpu.vector_store %arg4[%c0_36, %c0_37], %125 {strides = array<i32>} : memref<16x32xf32, #tpu.memory_space<vmem>>, vector<16x32xf32>,
    return
  }
}

</mosaic_0001>

<bundles_post_ra>
// kernel: tpu_custom_call.1
= control target key start
LH: loop header
LB: loop body
LE: loop exit
PB: predicated region body
PF: predicated region fallthrough
CT: control target
= control target key end

     0   :  { %vm33_vm0 = vcmask 261120   ;;  %v147_v2 = vlaneseq  ;;  %s1626_s0 = inlined_call_operand.vmem [shape: f32[48,32], index: 0, kind: input, shape index: {}]   ;;  %s1627_s1 = inlined_call_operand.vmem [shape: f32[32,96], index: 1, kind: input, shape index: {}]   ;;  %s1628_s2 = inlined_call_operand.vmem [shape: f32[32,32], index: 2, kind: input, shape index: {}]   ;;  %s1629_s3 = inlined_call_operand.vmem [shape: f32[4,32], index: 3, kind: input, shape index: {}]   ;;  %s1630_s4 = inlined_call_operand.hbm [shape: f32[16,32], index: 4, kind: output, shape index: {}]  }
   0x1   :  { %v27_v0 = vld [vmem:[%s1627_s1 + $0x18] sm:$0xff]  ;;  %v26_v1 = vld [vmem:[%s1627_s1 + $0x10] sm:$0xff]  ;;  %v18_v3 = vld [vmem:[%s1626_s0] sm:$0xff] }
   0x2   :  { %1238 = vmatprep.subr.mxu0 %v27_v0  ;;  %v25_v4 = vld [vmem:[%s1627_s1 + $0x8] sm:$0xff]  ;;  %1246 = vmatprep.mubr.msk.f32.mxu0 %vm33_vm0, %v18_v3  ;;  %v1451_v5 = vshrl.u32 %v147_v2, 7  ;;  %v1456_v6 = vld [vmem:[%s1629_s3] sm:$0xf] }
   0x3   :  { %1239 = vmatpush3.msra.mxu0 %v27_v0 }
   0x4   :  { %1240 = vmatprep.subr.mxu0 %v26_v1 }
   0x5   :  { %9 = vsyncpa [#allocation3], 0  ;;  %1241 = vmatpush3.msra.mxu0 %v26_v1  ;;  %v24_v7 = vld [vmem:[%s1627_s1] sm:$0xff]  ;;  %v157_v8 = vsub.s32 1, %v1451_v5  ;;  %v19_v9 = vld [vmem:[%s1626_s0 + $0x8] sm:$0xff]  ;;  %s1394_s30 = smov 32  }
   0x6   :  { %1242 = vmatprep.subr.mxu0 %v25_v4  ;;  %v20_v11 = vld [vmem:[%s1626_s0 + $0x10] sm:$0xff]  ;;  %v21_v12 = vld [vmem:[%s1626_s0 + $0x18] sm:$0xff]  ;;  %v149_v13 = vsub.s32 0, %v1451_v5  ;;  %v22_v15 = vld [vmem:[%s1626_s0 + $0x20] sm:$0xff]  ;;  %vm226_vm1 = vcmask 64512   ;;  %s1395_s10 = smov 96  }
   0x7   :  { %1243 = vmatpush3.msra.mxu0 %v25_v4  ;;  %v158_v10 = vrot.slane %v1456_v6, %v157_v8  ;;  %v23_v17 = vld [vmem:[%s1626_s0 + $0x28] sm:$0xff]  ;;  %s1396_s0 = smov 88   ;;  %s1397_s11 = smov 120   ;;  %v177_v34 = vadd.s32 8, %v1451_v5  ;;  %v203_v35 = vand.u32 127, %v147_v2  ;;  %v182_v38 = vand.u32 1, %v1451_v5 }
   0x8   :  { %1244 = vmatprep.subr.mxu0 %v24_v7  ;;  %v150_v16 = vrot.slane %v1456_v6, %v149_v13  ;;  %v1398_v39 = vmov -1e+30   ;;  %vm312_vm4 = vcmask 130048   ;;  %v167_v56 = vsub.s32 2, %v1451_v5  ;;  %s1399_s12 = smov 64   ;;  %s1400_s13 = smov 80  }
   0x9   :  { %1245 = vmatpush3.msra.mxu0 %v24_v7  ;;  %160 = vrot.lane.b32.xlu0 %v158_v10, %s1394_s30  ;;  %v189_v36 = vand.u32 1, %v177_v34  ;;  %v208_v37 = vand.u32 1, %v203_v35  ;;  %s1401_s14 = smov 56   ;;  %s1402_s15 = smov 112   ;;  %vm1052_vm5 = vcmask 195584  }
   0xa   :  { %1247 = vmatmul.mubr.msk.f32.vlgmr.msra.gmra.mxu0 %vm33_vm0, %v19_v9  ;;  %v168_v57 = vrot.slane %v1456_v6, %v167_v56  ;;  %s1403_s16 = smov 48   ;;  %s1404_s17 = smov 72  }
   0xb   :  { %1249 = vmatprep.mubr.msk.f32.mxu0 %vm33_vm0, %v20_v11  ;;  %vm217_vm2 = vcmp.eq.s32.totalorder %v189_v36, %v208_v37  ;;  %vm216_vm3 = vcmp.eq.s32.totalorder %v182_v38, %v208_v37  ;;  %s1405_s18 = smov 104   ;;  %s1406_s19 = smov 40  }
   0xc   :  { %v1516_v40 = vsel %vm217_vm2, 0.0, %v1398_v39  ;;  %v1518_v43 = vsel %vm216_vm3, 0.0, %v1398_v39  ;;  %s1407_s20 = smov 8   ;;  %s1408_s21 = smov 16  }
   0xd   :  { %s1409_s3 = smov 24  }
   0xe   :  { %1250 = vmatmul.mubr.msk.f32.gmra.mxu0 %vm33_vm0, %v21_v12 }
   0xf   :  { %1252 = vmatprep.mubr.msk.f32.mxu0 %vm33_vm0, %v22_v15 }
  0x12   :  { %1253 = vmatmul.mubr.msk.f32.gmra.mxu0 %vm33_vm0, %v23_v17 }
  0x7b   :  { %v161_v19 = vpop.permute.xlu0 %160 }
  0xca   :  { %v1248_v14 = vpop.f32.mrf.mxu0 }
  0xcb   :  { %v152_v26 = vadd.f32 %v1248_v14, %v150_v16 }
  0xcc   :  { %v118_v18 = vpop.f32.mrf.mxu0 }
  0xcd   :  { %v151_v20 = vadd.f32 %v150_v16, %v118_v18  ;;  %v1496_v27 = vmul.f32 0.35355338, %v152_v26 }
  0xce   :  { %v1251_v21 = vpop.f32.mrf.mxu0 }
  0xcf   :  { %v1485_v22 = vmul.f32 0.35355338, %v151_v20  ;;  %v1487_v23 = vadd.f32 %v1251_v21, %v161_v19 }
  0xd0   :  { %v128_v24 = vpop.f32.mrf.mxu0 }
  0xd1   :  { %v1489_v25 = vadd.f32 %v161_v19, %v128_v24  ;;  %1259 = vmatprep.mubr.msk.f32.mxu1 %vm226_vm1, %v1485_v22  ;;  %224 = vrot.lane.b32.xlu0 %v1487_v23, %s1395_s10 }
  0xd2   :  { %v1254_v42 = vpop.f32.mrf.mxu0 }
  0xd3   :  { %222 = vrot.lane.b32.xlu1 %v1489_v25, %s1395_s10 }
  0xd4   :  { %v138_v48 = vpop.f32.mrf.mxu0 }
  0xd5   :  { %428 = vrot.lane.b32.xlu0 %v1489_v25, %s1396_s0 }
  0xd7   :  { %430 = vrot.lane.b32.xlu1 %v1487_v23, %s1396_s0 }
  0xd9   :  { %426 = vrot.lane.b32.xlu0 %v1496_v27, %s1397_s11 }
  0xdb   :  { %424 = vrot.lane.b32.xlu1 %v1485_v22, %s1397_s11 }
 0x143   :  { %v225_v28 = vpop.permute.xlu0 %224 }
 0x144   :  { %1255 = vmatprep.subr.msk.mxu1 %vm226_vm1, %v225_v28 }
 0x145   :  { %1256 = vmatpush3.xpose.msk.msra.mxu1 %vm226_vm1, %v225_v28  ;;  %v223_v29 = vpop.permute.xlu1 %222 }
 0x146   :  { %1257 = vmatprep.subr.msk.mxu1 %vm226_vm1, %v223_v29 }
 0x147   :  { %v429_v31 = vpop.permute.xlu0 %428 }
 0x149   :  { %1258 = vmatpush3.xpose.msk.msra.mxu1 %vm226_vm1, %v223_v29  ;;  %v431_v30 = vpop.permute.xlu1 %430 }
 0x14a   :  { %1269 = vmatprep.subr.msk.mxu0 %vm226_vm1, %v431_v30 }
 0x14b   :  { %1270 = vmatpush3.xpose.msk.msra.mxu0 %vm226_vm1, %v431_v30  ;;  %v427_v33 = vpop.permute.xlu0 %426 }
 0x14c   :  { %1260 = vmatmul.mubr.msk.f32.vlgmr.msra.gmra.mxu1 %vm226_vm1, %v1496_v27  ;;  %1271 = vmatprep.subr.msk.mxu0 %vm226_vm1, %v429_v31 }
 0x14d   :  { %v425_v32 = vpop.permute.xlu1 %424 }
 0x14e   :  { %1273 = vmatprep.mubr.msk.f32.mxu0 %vm226_vm1, %v425_v32 }
 0x14f   :  { %1272 = vmatpush3.xpose.msk.msra.mxu0 %vm226_vm1, %v429_v31 }
 0x152   :  { %1274 = vmatmul.mubr.msk.f32.vlgmr.msra.gmra.mxu0 %vm226_vm1, %v427_v33 }
 0x20c   :  { %v1261_v41 = vpop.f32.mrf.mxu1 }
 0x20d   :  { %v309_v44 = vadd.f32 %v1261_v41, %v1516_v40 }
 0x20e   :  { %v303_v45 = vpop.f32.mrf.mxu1 }
 0x20f   :  { %v304_v46 = vadd.f32 %v303_v45, %v1518_v43  ;;  %v316_v47 = vsel %vm312_vm4, %v309_v44, -inf }
 0x210   :  { %317 = vmax.xlane.f32.xlu0 %v316_v47 }
 0x211   :  { %v313_v49 = vsel %vm312_vm4, %v304_v46, -inf }
 0x212   :  { %314 = vmax.xlane.f32.xlu1 %v313_v49  ;;  %v1275_v50 = vpop.f32.mrf.mxu0 }
 0x213   :  { %v512_v51 = vadd.f32 %v1275_v50, %v1516_v40 }
 0x214   :  { %v506_v52 = vpop.f32.mrf.mxu0 }
 0x215   :  { %v507_v53 = vadd.f32 %v506_v52, %v1518_v43  ;;  %v518_v54 = vsel %vm312_vm4, %v512_v51, -inf }
 0x216   :  { %519 = vmax.xlane.f32.xlu1 %v518_v54 }
 0x217   :  { %v515_v55 = vsel %vm312_vm4, %v507_v53, -inf }
 0x218   :  { %516 = vmax.xlane.f32.xlu0 %v515_v55 }
 0x22e   :  { %170 = vrot.lane.b32.xlu0 %v168_v57, %s1399_s12 }
 0x299   :  { %v318_v58 = vpop.xlane.xlu0 %317 }
 0x29a   :  { %v320_v0 = vsub.f32 %v309_v44, %v318_v58 }
 0x29b   :  { %v315_v63 = vpop.xlane.xlu1 %314 }
 0x29c   :  { %v323_v2 = vmul.f32 1.442695, %v320_v0  ;;  %v319_v4 = vsub.f32 %v304_v46, %v315_v63 }
 0x29e   :  { %1340 = vpow2.f32 %v323_v2  ;;  %v321_v8 = vmul.f32 1.442695, %v319_v4 }
 0x29f   :  { %v520_v1 = vpop.xlane.xlu1 %519 }
 0x2a0   :  { %v522_v3 = vsub.f32 %v512_v51, %v520_v1 }
 0x2a1   :  { %v517_v59 = vpop.xlane.xlu0 %516 }
 0x2a2   :  { %v525_v7 = vmul.f32 1.442695, %v522_v3  ;;  %v521_v9 = vsub.f32 %v507_v53, %v517_v59 }
 0x2a4   :  { %1342 = vpow2.f32 %v525_v7  ;;  %v523_v10 = vmul.f32 1.442695, %v521_v9 }
 0x2a5   :  { %v171_v60 = vpop.permute.xlu0 %170  ;;  %1344 = vpow2.f32 %v321_v8 }
 0x2a6   :  { %v1530_v61 = vadd.f32 %v171_v60, %v138_v48  ;;  %v1532_v62 = vadd.f32 %v1254_v42, %v171_v60  ;;  %1346 = vpow2.f32 %v523_v10 }
 0x2a8   :  { %339 = vrot.lane.b32.xlu1 %v1532_v62, %s1399_s12  ;;  %337 = vrot.lane.b32.xlu0 %v1530_v61, %s1399_s12 }
 0x2ab   :  { %v1341_v11 = vpop.eup %1340 }
 0x2ac   :  { %628 = vrot.lane.b32.xlu1 %v1489_v25, %s1400_s13  ;;  %539 = vrot.lane.b32.xlu0 %v1532_v62, %s1401_s14  ;;  %v328_v12 = vsel %vm312_vm4, %v1341_v11, 0.0 }
 0x2b0   :  { %537 = vrot.lane.b32.xlu0 %v1530_v61, %s1401_s14 }
 0x2b1   :  { %v1343_v13 = vpop.eup %1342 }
 0x2b2   :  { %v530_v14 = vsel %vm312_vm4, %v1343_v13, 0.0  ;;  %v1345_v15 = vpop.eup %1344 }
 0x2b3   :  { %v325_v16 = vsel %vm312_vm4, %v1345_v15, 0.0  ;;  %v1347_v17 = vpop.eup %1346 }
 0x2b4   :  { %630 = vrot.lane.b32.xlu0 %v1487_v23, %s1400_s13  ;;  %v527_v18 = vsel %vm312_vm4, %v1347_v17, 0.0 }
 0x2b8   :  { %624 = vrot.lane.b32.xlu0 %v1485_v22, %s1402_s15 }
 0x2d0   :  { %329 = vadd.xlane.f32.xlu1 %v328_v12 }
 0x2d4   :  { %531 = vadd.xlane.f32.xlu1 %v530_v14 }
 0x2d8   :  { %326 = vadd.xlane.f32.xlu1 %v325_v16 }
 0x2dc   :  { %528 = vadd.xlane.f32.xlu1 %v527_v18 }
 0x2ed   :  { %626 = vrot.lane.b32.xlu1 %v1496_v27, %s1402_s15 }
 0x31a   :  { %v340_v19 = vpop.permute.xlu1 %339  ;;  %v338_v20 = vpop.permute.xlu0 %337 }
 0x31b   :  { %1262 = vmatprep.subr.mxu1 %v340_v19 }
 0x31c   :  { %1263 = vmatpush3.msra.mxu1 %v340_v19 }
 0x31d   :  { %1264 = vmatprep.subr.mxu1 %v338_v20 }
 0x31e   :  { %1265 = vmatpush3.msra.mxu1 %v338_v20  ;;  %v540_v21 = vpop.permute.xlu0 %539  ;;  %v629_v24 = vpop.permute.xlu1 %628 }
 0x31f   :  { %1276 = vmatprep.subr.mxu1 %v540_v21 }
 0x322   :  { %v538_v31 = vpop.permute.xlu0 %537 }
 0x326   :  { %v631_v35 = vpop.permute.xlu0 %630 }
 0x32a   :  { %v625_v42 = vpop.permute.xlu0 %624 }
 0x359   :  { %v330_v26 = vpop.xlane.xlu1 %329 }
 0x35a   :  { %1348 = vrcp.f32 %v330_v26 }
 0x35d   :  { %v532_v28 = vpop.xlane.xlu1 %531 }
 0x361   :  { %v327_v29 = vpop.xlane.xlu1 %326 }
 0x362   :  { %1350 = vrcp.f32 %v327_v29 }
 0x363   :  { %1352 = vrcp.f32 %v532_v28 }
 0x365   :  { %v529_v30 = vpop.xlane.xlu1 %528 }
 0x366   :  { %1354 = vrcp.f32 %v529_v30 }
 0x367   :  { %v1349_v32 = vpop.eup %1348 }
 0x368   :  { %v334_v36 = vmul.f32 %v1349_v32, %v1341_v11 }
 0x369   :  { %v627_v44 = vpop.permute.xlu1 %626 }
 0x36f   :  { %v1351_v33 = vpop.eup %1350 }
 0x370   :  { %v333_v34 = vmul.f32 %v1351_v33, %v1345_v15  ;;  %v1353_v37 = vpop.eup %1352 }
 0x371   :  { %v536_v41 = vmul.f32 %v1353_v37, %v1343_v13 }
 0x372   :  { %1266 = vmatprep.mubr.msk.f32.mxu1 %vm312_vm4, %v333_v34 }
 0x373   :  { %v1355_v38 = vpop.eup %1354  ;;  %1267 = vmatmul.mubr.msk.f32.vlgmr.msra.gmra.mxu1 %vm312_vm4, %v334_v36 }
 0x374   :  { %1277 = vmatpush3.msra.mxu1 %v540_v21  ;;  %v535_v39 = vmul.f32 %v1355_v38, %v1347_v17 }
 0x375   :  { %1278 = vmatprep.subr.mxu1 %v538_v31 }
 0x376   :  { %1279 = vmatpush3.msra.mxu1 %v538_v31  ;;  %1280 = vmatprep.mubr.msk.f32.mxu1 %vm312_vm4, %v535_v39 }
 0x377   :  { %1283 = vmatprep.subr.msk.mxu1 %vm226_vm1, %v631_v35  ;;  %1281 = vmatmul.mubr.msk.f32.vlgmr.msra.gmra.mxu1 %vm312_vm4, %v536_v41  ;;  %v30_v41 = vld [vmem:[%s1628_s2 + $0x10] sm:$0xff] }
 0x378   :  { %1284 = vmatpush3.xpose.msk.msra.mxu1 %vm226_vm1, %v631_v35  ;;  %1287 = vmatprep.mubr.msk.f32.mxu1 %vm226_vm1, %v625_v42  ;;  %v29_v42 = vld [vmem:[%s1628_s2 + $0x8] sm:$0xff] }
 0x379   :  { %1285 = vmatprep.subr.msk.mxu1 %vm226_vm1, %v629_v24 }
 0x37c   :  { %1286 = vmatpush3.xpose.msk.msra.mxu1 %vm226_vm1, %v629_v24 }
 0x37f   :  { %1288 = vmatmul.mubr.msk.f32.vlgmr.msra.gmra.mxu1 %vm226_vm1, %v627_v44  ;;  %v28_v44 = vld [vmem:[%s1628_s2] sm:$0xff] }
 0x433   :  { %v1556_v45 = vpop.f32.mrf.mxu1 }
 0x435   :  { %v1558_v46 = vpop.f32.mrf.mxu1 }
 0x437   :  { %v1560_v47 = vpop.f32.mrf.mxu1 }
 0x439   :  { %v1562_v48 = vpop.f32.mrf.mxu1 }
 0x43f   :  { %v1289_v49 = vpop.f32.mrf.mxu1 }
 0x440   :  { %v712_v50 = vadd.f32 %v1289_v49, %v1516_v40 }
 0x441   :  { %v706_v51 = vpop.f32.mrf.mxu1 }
 0x442   :  { %v707_v52 = vadd.f32 %v706_v51, %v1518_v43  ;;  %v718_v53 = vsel %vm312_vm4, %v712_v50, -inf }
 0x443   :  { %719 = vmax.xlane.f32.xlu1 %v718_v53 }
 0x444   :  { %v715_v54 = vsel %vm312_vm4, %v707_v52, -inf }
 0x445   :  { %716 = vmax.xlane.f32.xlu0 %v715_v54 }
 0x454   :  { %739 = vrot.lane.b32.xlu1 %v1532_v62, %s1403_s16 }
 0x458   :  { %830 = vrot.lane.b32.xlu1 %v1487_v23, %s1404_s17 }
 0x45c   :  { %828 = vrot.lane.b32.xlu1 %v1489_v25, %s1404_s17 }
 0x460   :  { %826 = vrot.lane.b32.xlu1 %v1496_v27, %s1405_s18 }
 0x4cc   :  { %v720_v55 = vpop.xlane.xlu1 %719 }
 0x4cd   :  { %v722_v56 = vsub.f32 %v712_v50, %v720_v55 }
 0x4ce   :  { %v717_v57 = vpop.xlane.xlu0 %716 }
 0x4cf   :  { %v725_v58 = vmul.f32 1.442695, %v722_v56  ;;  %v721_v59 = vsub.f32 %v707_v52, %v717_v57 }
 0x4d0   :  { %v740_v60 = vpop.permute.xlu1 %739 }
 0x4d1   :  { %1356 = vpow2.f32 %v725_v58  ;;  %v723_v63 = vmul.f32 1.442695, %v721_v59  ;;  %1290 = vmatprep.subr.mxu0 %v740_v60 }
 0x4d2   :  { %1291 = vmatpush3.msra.mxu0 %v740_v60 }
 0x4d3   :  { %1358 = vpow2.f32 %v723_v63  ;;  %v1057_v63 = vsub.s32 3, %v1451_v5 }
 0x4d4   :  { %v831_v4 = vpop.permute.xlu1 %830 }
 0x4de   :  { %v1357_v0 = vpop.eup %1356 }
 0x4df   :  { %v730_v1 = vsel %vm312_vm4, %v1357_v0, 0.0 }
 0x4e0   :  { %v1359_v23 = vpop.eup %1358  ;;  %731 = vadd.xlane.f32.xlu0 %v730_v1 }
 0x4e1   :  { %v727_v25 = vsel %vm312_vm4, %v1359_v23, 0.0 }
 0x4e4   :  { %728 = vadd.xlane.f32.xlu0 %v727_v25 }
 0x4fa   :  { %737 = vrot.lane.b32.xlu0 %v1530_v61, %s1403_s16 }
 0x4fe   :  { %824 = vrot.lane.b32.xlu0 %v1485_v22, %s1405_s18  ;;  %v829_v22 = vpop.permute.xlu1 %828 }
 0x502   :  { %v827_v12 = vpop.permute.xlu1 %826 }
 0x569   :  { %v732_v27 = vpop.xlane.xlu0 %731 }
 0x56a   :  { %1360 = vrcp.f32 %v732_v27 }
 0x56d   :  { %v729_v2 = vpop.xlane.xlu0 %728 }
 0x56e   :  { %1362 = vrcp.f32 %v729_v2 }
 0x571   :  { %v738_v3 = vpop.permute.xlu0 %737 }
 0x572   :  { %1292 = vmatprep.subr.mxu0 %v738_v3 }
 0x573   :  { %1293 = vmatpush3.msra.mxu0 %v738_v3 }
 0x574   :  { %1297 = vmatprep.subr.msk.mxu0 %vm226_vm1, %v831_v4 }
 0x575   :  { %v825_v11 = vpop.permute.xlu0 %824 }
 0x577   :  { %v1361_v7 = vpop.eup %1360 }
 0x578   :  { %v736_v10 = vmul.f32 %v1361_v7, %v1357_v0 }
 0x57b   :  { %v1363_v8 = vpop.eup %1362 }
 0x57c   :  { %v735_v9 = vmul.f32 %v1363_v8, %v1359_v23 }
 0x57e   :  { %1294 = vmatprep.mubr.msk.f32.mxu0 %vm312_vm4, %v735_v9 }
 0x57f   :  { %1295 = vmatmul.mubr.msk.f32.vlgmr.msra.gmra.mxu0 %vm312_vm4, %v736_v10 }
 0x580   :  { %1298 = vmatpush3.xpose.msk.msra.mxu0 %vm226_vm1, %v831_v4  ;;  %1301 = vmatprep.mubr.msk.f32.mxu0 %vm226_vm1, %v825_v11 }
 0x581   :  { %1299 = vmatprep.subr.msk.mxu0 %vm226_vm1, %v829_v22 }
 0x584   :  { %1300 = vmatpush3.xpose.msk.msra.mxu0 %vm226_vm1, %v829_v22 }
 0x587   :  { %1302 = vmatmul.mubr.msk.f32.vlgmr.msra.gmra.mxu0 %vm226_vm1, %v827_v12 }
 0x63f   :  { %v1296_v13 = vpop.f32.mrf.mxu0 }
 0x641   :  { %v815_v14 = vpop.f32.mrf.mxu0 }
 0x647   :  { %v1303_v15 = vpop.f32.mrf.mxu0 }
 0x648   :  { %v912_v16 = vadd.f32 %v1303_v15, %v1516_v40 }
 0x649   :  { %v906_v17 = vpop.f32.mrf.mxu0 }
 0x64a   :  { %v907_v18 = vadd.f32 %v906_v17, %v1518_v43  ;;  %v918_v19 = vsel %vm312_vm4, %v912_v16, -inf }
 0x64b   :  { %919 = vmax.xlane.f32.xlu1 %v918_v19 }
 0x64c   :  { %v915_v20 = vsel %vm312_vm4, %v907_v18, -inf }
 0x64d   :  { %916 = vmax.xlane.f32.xlu0 %v915_v20 }
 0x65c   :  { %939 = vrot.lane.b32.xlu1 %v1532_v62, %s1406_s19 }
 0x660   :  { %1026 = vrot.lane.b32.xlu1 %v1562_v48, %s1407_s20 }
 0x664   :  { %1028 = vrot.lane.b32.xlu1 %v1560_v47, %s1407_s20 }
 0x668   :  { %1036 = vrot.lane.b32.xlu1 %v1296_v13, %s1408_s21 }
 0x6d4   :  { %v920_v40 = vpop.xlane.xlu1 %919 }
 0x6d5   :  { %v922_v43 = vsub.f32 %v912_v16, %v920_v40 }
 0x6d6   :  { %v917_v21 = vpop.xlane.xlu0 %916 }
 0x6d7   :  { %v925_v24 = vmul.f32 1.442695, %v922_v43  ;;  %v921_v26 = vsub.f32 %v907_v18, %v917_v21 }
 0x6d8   :  { %v940_v28 = vpop.permute.xlu1 %939 }
 0x6d9   :  { %1364 = vpow2.f32 %v925_v24  ;;  %v923_v29 = vmul.f32 1.442695, %v921_v26  ;;  %1304 = vmatprep.subr.mxu1 %v940_v28 }
 0x6da   :  { %1305 = vmatpush3.msra.mxu1 %v940_v28 }
 0x6db   :  { %1366 = vpow2.f32 %v923_v29 }
 0x6dc   :  { %v1027_v49 = vpop.permute.xlu1 %1026 }
 0x6dd   :  { %v1048_v53 = vsel %vm226_vm1, %v1558_v46, %v1027_v49  ;;  %v1058_v46 = vrot.slane %v1456_v6, %v1057_v63 }
 0x6e0   :  { %v1029_v50 = vpop.permute.xlu1 %1028 }
 0x6e1   :  { %v1049_v55 = vsel %vm226_vm1, %v1556_v45, %v1029_v50 }
 0x6e4   :  { %v1037_v51 = vpop.permute.xlu1 %1036 }
 0x6e5   :  { %v1051_v58 = vsel %vm312_vm4, %v1049_v55, %v1037_v51 }
 0x6e6   :  { %v1365_v62 = vpop.eup %1364 }
 0x6e7   :  { %v930_v30 = vsel %vm312_vm4, %v1365_v62, 0.0 }
 0x6e8   :  { %v1367_v31 = vpop.eup %1366  ;;  %931 = vadd.xlane.f32.xlu0 %v930_v30 }
 0x6e9   :  { %v927_v32 = vsel %vm312_vm4, %v1367_v31, 0.0 }
 0x6ec   :  { %928 = vadd.xlane.f32.xlu0 %v927_v32 }
 0x702   :  { %937 = vrot.lane.b32.xlu0 %v1530_v61, %s1406_s19  ;;  %v31_v61 = vld [vmem:[%s1628_s2 + $0x18] sm:$0xff]  ;;  %s1410_s2 = smov [#allocation2]  }
 0x703   :  { %s1147_s30 = sshll.u32 %s1410_s2, 4  ;;  %s1148_s30 = int_to_ptr.vmem [resolvable:$true] %s1147_s30 }
 0x704   :  { %s1372_s1 = scalar_lea.vmem %s1148_s30, 256  ;;  %p1377_p1 = scmp.lt.s32.totalorder %s1148_s30, %s1148_s30 }
 0x705   :  { %p1373_p0 = scmp.ne.s32.totalorder %s1148_s30, %s1372_s1  ;;  %p1378_p2 = scmp.lt.s32.totalorder %s1372_s1, %s1372_s1 }
 0x706   :  { %1034 = vrot.lane.b32.xlu0 %v815_v14, %s1408_s21 }
 0x707   :  { %p1379_p3 = por %p1378_p2, %p1377_p1 }
 0x709   :  { %p1380_p4 = pnand %p1379_p3, %p1373_p0 }
 0x771   :  { %v932_v33 = vpop.xlane.xlu0 %931 }
 0x772   :  { %1368 = vrcp.f32 %v932_v33 }
 0x775   :  { %v929_v34 = vpop.xlane.xlu0 %928 }
 0x776   :  { %1370 = vrcp.f32 %v929_v34 }
 0x779   :  { %v938_v35 = vpop.permute.xlu0 %937 }
 0x77a   :  { %1306 = vmatprep.subr.mxu1 %v938_v35 }
 0x77b   :  { %1307 = vmatpush3.msra.mxu1 %v938_v35 }
 0x77c   :  { %1311 = vmatprep.subr.mxu1 %v31_v61 }
 0x77d   :  { %v1035_v52 = vpop.permute.xlu0 %1034 }
 0x77e   :  { %v1050_v56 = vsel %vm312_vm4, %v1048_v53, %v1035_v52 }
 0x77f   :  { %v1369_v36 = vpop.eup %1368 }
 0x780   :  { %v936_v39 = vmul.f32 %v1369_v36, %v1365_v62 }
 0x783   :  { %v1371_v37 = vpop.eup %1370 }
 0x784   :  { %v935_v38 = vmul.f32 %v1371_v37, %v1367_v31 }
 0x786   :  { %1308 = vmatprep.mubr.msk.f32.mxu1 %vm312_vm4, %v935_v38 }
 0x787   :  { %1309 = vmatmul.mubr.msk.f32.vlgmr.msra.gmra.mxu1 %vm312_vm4, %v936_v39 }
 0x788   :  { %1312 = vmatpush3.msra.mxu1 %v31_v61 }
 0x789   :  { %1313 = vmatprep.subr.mxu1 %v30_v41 }
 0x78a   :  { %1314 = vmatpush3.msra.mxu1 %v30_v41 }
 0x78b   :  { %1315 = vmatprep.subr.mxu1 %v29_v42 }
 0x78c   :  { %1316 = vmatpush3.msra.mxu1 %v29_v42 }
 0x78d   :  { %1317 = vmatprep.subr.mxu1 %v28_v44 }
 0x78e   :  { %1318 = vmatpush3.msra.mxu1 %v28_v44 }
 0x847   :  { %v1310_v47 = vpop.f32.mrf.mxu1 }
 0x848   :  { %1044 = vrot.lane.b32.xlu1 %v1310_v47, %s1409_s3 }
 0x849   :  { %v1015_v48 = vpop.f32.mrf.mxu1 }
 0x84a   :  { %1042 = vrot.lane.b32.xlu0 %v1015_v48, %s1409_s3 }
 0x8ba   :  { %v1045_v54 = vpop.permute.xlu1 %1044 }
 0x8bb   :  { %v1054_v60 = vsel %vm1052_vm5, %v1051_v58, %v1045_v54 }
 0x8bc   :  { %v1043_v57 = vpop.permute.xlu0 %1042 }
 0x8bd   :  { %v1053_v59 = vsel %vm1052_vm5, %v1050_v56, %v1043_v57 }
 0x8be   :  { %1319 = vmatprep.mubr.msk.f32.mxu1 %vm33_vm0, %v1053_v59 }
 0x8bf   :  { %1320 = vmatmul.mubr.msk.f32.vlgmr.msra.gmra.mxu1 %vm33_vm0, %v1054_v60 }
 0x97f   :  { %v1321_v0 = vpop.f32.mrf.mxu1 }
 0x980   :  { %v1137_v1 = vadd.f32 %v1321_v0, %v1058_v46 }
 0x981   :  { %v1131_v45 = vpop.f32.mrf.mxu1 }
 0x982   :  { %1141 = vst.msk [vmem:[#allocation2 + $0x8] sm:$0xff] %vm33_vm0, %v1137_v1  ;;  %v1132_v23 = vadd.f32 %v1131_v45, %v1058_v46 }
 0x984   :  { %1140 = vst.msk [vmem:[#allocation2] sm:$0xff] %vm33_vm0, %v1132_v23 }
 0x985   :  { %1383 = shalt.err (!%p1380_p4)
}
 0x986   :  { %s1411_s5 = smov 128  }
 0x987   :  { %1153 = dma.vmem_to_hbm [thread:$0]  %s1148_s30, 256, %s1630_s4, [#allocation3], %s1411_s5, %s1411_s5, %s1407_s20  }
 0x988   :  { %1392 = dma.done.wait [#allocation3], 256  }
 0x989   :  { %1393 = vsyncadd [#allocation3], 4294967040 }
 0x98a   :  { %1157 = vsyncpa [#allocation3], 1 }

</bundles_post_ra>
